<compile_context>
chip_gen: v7x
topology: tpu7x:2x2x1
jax: 0.10.0
libtpu: 0.0.40
codegen_flags: <defaults>
</compile_context>

<pallas_src>
import functools

import jax
import jax.numpy as jnp
from jax.experimental import pallas as pl
from jax.experimental.pallas import tpu as pltpu


def _round_up(n: int, m: int) -> int:
    return ((n + m - 1) // m) * m


def _cdiv(a: int, b: int) -> int:
    return -(-a // b)


def _choose_block_rows(B: int, row_bytes: int, itemsize: int, requested):
    """Pick (block_rows, num_blocks, sublane_mult) for the batch axis."""
    sub = max(8, 32 // max(itemsize, 1))     # 8 f32 / 16 bf16 / 32 int8-fp8
    if B <= sub:
        # Single block equal to the full array dims (exempt from tiling rule).
        return B, 1, sub
    max_block = (B // sub) * sub             # largest aligned block <= B

    if requested is not None:
        br = max(sub, min((int(requested) // sub) * sub, max_block))
        return br, _cdiv(B, br), sub

    # ~2 MiB per input buffer: past the streaming-roofline plateau, fits the
    # v5e scoped-VMEM default even with double-buffering + f32 temps.
    budget = 2 * 1024 * 1024
    ideal = max(sub, (budget // max(row_bytes, 1)) // sub * sub)
    ideal = min(ideal, max_block)
    nb = _cdiv(B, ideal)
    if nb == 1 and B >= 2 * sub:
        nb = 2                               # let v7x's two TCs split the grid
    br = min(max(sub, _round_up(_cdiv(B, nb), sub)), max_block)
    nb = _cdiv(B, br)
    return br, nb, sub


def _reg_kernel(x_ref, out_ref, *, compute_delta, compute_drift, param_dim,
                seq_len, total_rows, block_rows, mask_tail):
    """Per-block raw sums.

    x_ref  : (block_rows, T*P) lane-dense block of the input (native dtype).
    out_ref: (1, 2, 128) f32 per-step output block; sublane 0 holds
             sum(x^2), sublane 1 holds sum((x[:, t-1, :] - x[:, t, :])^2).
    """
    x = x_ref[...].astype(jnp.float32)        # cast in-register only

    if mask_tail:
        # The last grid block extends past the true batch size; those rows
        # hold whatever the DMA window picked up.  Zero them: zero rows add 0
        # to both raw sums and the wrapper divides by the true counts.
        valid = total_rows - pl.program_id(0) * block_rows
        rows = jax.lax.broadcasted_iota(jnp.int32, x.shape, 0)
        x = jnp.where(rows < valid, x, jnp.float32(0.0))

    delta_sum = jnp.float32(0.0)
    drift_sum = jnp.float32(0.0)

    if compute_delta:
        delta_sum = jnp.sum(x * x)

    if compute_drift and seq_len > 1:
        # flat[b, t*P + p] == pred[b, t, p]; adjacent-time differences are a
        # P-lane-shifted subtraction (no roll, no full-shape mask temps).
        d = x[:, : (seq_len - 1) * param_dim] - x[:, param_dim:]
        drift_sum = jnp.sum(d * d)

    lane = jax.lax.broadcasted_iota(jnp.int32, (1, 2, 128), 1)
    out_ref[...] = jnp.where(lane == 0, delta_sum, drift_sum)


@functools.partial(
    jax.jit,
    static_argnames=("delta_w", "drift_w", "ret_each_term", "block_rows"),
)
def _reg_pallas(pred_params, *, delta_w, drift_w, ret_each_term, block_rows=None):
    B, T, P = pred_params.shape
    compute_delta = delta_w != 0
    compute_drift = drift_w != 0

    if not (compute_delta or compute_drift):
        z = jnp.float32(0.0)
        return (z, z) if ret_each_term else z

    itemsize = pred_params.dtype.itemsize
    x2 = pred_params.reshape(B, T * P)        # bitcast reshape; lane-dense

    br, num_blocks, _sub = _choose_block_rows(B, T * P * itemsize, itemsize, block_rows)
    mask_tail = (br * num_blocks != B)

    # Explicit scoped-VMEM budget: input double-buffer (native dtype) plus
    # generous room for the in-kernel f32 temps (cast, slices, diff, squares).
    # Capped at 48 MiB so it fits v7x's 64 MiB physical VMEM per TensorCore.
    block_elems = br * T * P
    est = 2 * block_elems * itemsize + 6 * block_elems * 4 + (1 << 20)
    vmem_limit = int(min(max(2 * est, 24 << 20), 48 << 20))

    kernel = functools.partial(
        _reg_kernel,
        compute_delta=compute_delta,
        compute_drift=compute_drift,
        param_dim=P,
        seq_len=T,
        total_rows=B,
        block_rows=br,
        mask_tail=mask_tail,
    )

    # Each grid step owns its (1, 2, 128) output block => the batch-block axis
    # is genuinely parallel (v7x splits it across its 2 TensorCores; on
    # v5e/v6e it runs sequentially either way).
    partials = pl.pallas_call(
        kernel,
        out_shape=jax.ShapeDtypeStruct((num_blocks, 2, 128), jnp.float32),
        grid=(num_blocks,),
        in_specs=[pl.BlockSpec((br, T * P), lambda i: (i, 0))],
        out_specs=pl.BlockSpec((1, 2, 128), lambda i: (i, 0, 0)),
        compiler_params=pltpu.CompilerParams(
            dimension_semantics=("parallel",),
            vmem_limit_bytes=vmem_limit,
        ),
    )(x2)

    # Tiny final reduce + exact normalization (fuses into one small XLA op).
    totals = jnp.sum(partials[:, :, 0], axis=0)
    delta_mean = totals[0] / jnp.float32(B * T * P)
    # Note: T == 1 gives 0/0 = nan, matching torch.mean of an empty tensor.
    drift_mean = totals[1] / jnp.float32(B * (T - 1) * P)

    delta_reg = jnp.float32(delta_w) * delta_mean if compute_delta else jnp.float32(0.0)
    drift_reg = jnp.float32(drift_w) * drift_mean if compute_drift else jnp.float32(0.0)

    if ret_each_term:
        return delta_reg, drift_reg
    return delta_reg + drift_reg


class RegularizationCalculatorDeltaIJ:
    """JAX/Pallas re-implementation of the PyTorch module."""

    def __init__(self, loss_params, block_rows=None):
        self.params = loss_params
        self.block_rows = block_rows  # optional tuning knob; None = auto

    def __call__(self, global_theta, pred_params, hidden_states,
                 step_ahead_cov_preds, batch, ret_each_term=False):
        return _reg_pallas(
            pred_params,
            delta_w=float(self.params["delta_reg"]),
            drift_w=float(self.params["drift_reg"]),
            ret_each_term=ret_each_term,
            block_rows=self.block_rows,
        )


def _reference_terms(pred_params, delta_w, drift_w):
    x = pred_params.astype(jnp.float32)
    delta = jnp.mean(x * x) if delta_w != 0 else jnp.float32(0.0)
    d = x[:, :-1, :] - x[:, 1:, :]
    drift = jnp.mean(d * d) if drift_w != 0 else jnp.float32(0.0)
    return jnp.float32(delta_w) * delta, jnp.float32(drift_w) * drift


if __name__ == "__main__":
    key = jax.random.PRNGKey(0)
    k1, k2, k3, k4, k5, k6 = jax.random.split(key, 6)

    B, T, P = 32, 8, 32
    pred_params = jax.random.normal(k1, (B, T, P), dtype=jnp.float32)
    # Unused-by-forward inputs, built only for signature parity.
    global_theta = jax.random.normal(k2, (P,), dtype=jnp.float32)
    hidden_states = jax.random.normal(k3, (B, T, 16), dtype=jnp.float32)
    step_ahead_cov_preds = jax.random.normal(k4, (B, T, 4), dtype=jnp.float32)
    batch = jnp.zeros((B, T), dtype=jnp.float32)

    loss_params = {"delta_reg": 0.5, "drift_reg": 0.25}
    module = RegularizationCalculatorDeltaIJ(loss_params)

    # Auto block selection (forces a 2-block grid here -> multi-block path).
    out = jax.block_until_ready(
        module(global_theta, pred_params, hidden_states, step_ahead_cov_preds, batch)
    )
    ref_d, ref_r = _reference_terms(pred_params, 0.5, 0.25)
    assert jnp.allclose(out, ref_d + ref_r, rtol=1e-5, atol=1e-6), (out, ref_d + ref_r)

    # ret_each_term branch.
    d_term, r_term = module(global_theta, pred_params, hidden_states,
                            step_ahead_cov_preds, batch, ret_each_term=True)
    jax.block_until_ready((d_term, r_term))
    assert jnp.allclose(d_term, ref_d, rtol=1e-5, atol=1e-6), (d_term, ref_d)
    assert jnp.allclose(r_term, ref_r, rtol=1e-5, atol=1e-6), (r_term, ref_r)

    # Ragged batch (B=10, block_rows=8) exercises the in-kernel tail masking
    # (no wrapper-side pad copy anymore).
    module8 = RegularizationCalculatorDeltaIJ(loss_params, block_rows=8)
    pred2 = jax.random.normal(k5, (10, T, P), dtype=jnp.float32)
    out2 = jax.block_until_ready(
        module8(global_theta, pred2, hidden_states, step_ahead_cov_preds, batch)
    )
    ref2_d, ref2_r = _reference_terms(pred2, 0.5, 0.25)
    assert jnp.allclose(out2, ref2_d + ref2_r, rtol=1e-5, atol=1e-6), (out2, ref2_d + ref2_r)

    # Zero drift weight: drift compute is statically skipped in the kernel.
    module_nodrift = RegularizationCalculatorDeltaIJ(
        {"delta_reg": 0.3, "drift_reg": 0.0}, block_rows=8)
    out3 = jax.block_until_ready(
        module_nodrift(global_theta, pred_params, hidden_states,
                       step_ahead_cov_preds, batch)
    )
    ref3_d, _ = _reference_terms(pred_params, 0.3, 0.0)
    assert jnp.allclose(out3, ref3_d, rtol=1e-5, atol=1e-6), (out3, ref3_d)

    # bf16 input: native-dtype DMA + in-register f32 cast, 16-row sublane
    # multiple, ragged tail masking (B=24 -> two 16-row blocks).
    pred_bf16 = jax.random.normal(k6, (24, T, P), dtype=jnp.float32).astype(jnp.bfloat16)
    out_bf = jax.block_until_ready(
        module(global_theta, pred_bf16, hidden_states, step_ahead_cov_preds, batch)
    )
    refb_d, refb_r = _reference_terms(pred_bf16, 0.5, 0.25)
    assert jnp.allclose(out_bf, refb_d + refb_r, rtol=1e-3, atol=1e-5), (out_bf, refb_d + refb_r)

    print("KERNEL_OK")
</pallas_src>

<mosaic_0001>
module attributes {stable_mosaic.version = 11 : i64} {
  func.func @_reg_kernel(%arg0: i32, %arg1: memref<16x256xf32, #tpu.memory_space<vmem>>, %arg2: memref<1x2x128xf32, #tpu.memory_space<vmem>>) attributes {dimension_semantics = [#tpu.dimension_semantics<parallel>], iteration_bounds = array<i64: 2>, scalar_prefetch = 0 : i64, scratch_operands = 0 : i64, tpu.core_type = #tpu.core_type<tc>, window_params = [{transform_indices = @transform_0, window_bounds = array<i64: 16, 256>}, {transform_indices = @transform_1, window_bounds = array<i64: 1, 2, 128>}]} {
    %c0 = arith.constant 0 : index
    %c0_0 = arith.constant 0 : index
    %0 = vector.load %arg1[%c0, %c0_0] : memref<16x256xf32, #tpu.memory_space<vmem>>, vector<16x256xf32>
    %1 = arith.mulf %0, %0 : vector<16x256xf32>
    %2 = vector.shape_cast %1 : vector<16x256xf32> to vector<1x16x256xf32>
    %cst = arith.constant dense<0.000000e+00> : vector<1xf32>
    %3 = vector.multi_reduction <add>, %2, %cst [1, 2] : vector<1x16x256xf32> to vector<1xf32>
    %4 = vector.shape_cast %3 : vector<1xf32> to vector<1x1x1xf32>
    %5 = vector.extract %4[0, 0, 0] : f32 from vector<1x1x1xf32>
    %6 = vector.extract_strided_slice %0 {offsets = [0, 0], sizes = [16, 224], strides = [1, 1]} : vector<16x256xf32> to vector<16x224xf32>
    %7 = vector.extract_strided_slice %0 {offsets = [0, 32], sizes = [16, 224], strides = [1, 1]} : vector<16x256xf32> to vector<16x224xf32>
    %8 = arith.subf %6, %7 : vector<16x224xf32>
    %9 = arith.mulf %8, %8 : vector<16x224xf32>
    %10 = vector.shape_cast %9 : vector<16x224xf32> to vector<1x16x224xf32>
    %cst_1 = arith.constant dense<0.000000e+00> : vector<1xf32>
    %11 = vector.multi_reduction <add>, %10, %cst_1 [1, 2] : vector<1x16x224xf32> to vector<1xf32>
    %12 = vector.shape_cast %11 : vector<1xf32> to vector<1x1x1xf32>
    %13 = vector.extract %12[0, 0, 0] : f32 from vector<1x1x1xf32>
    %14 = tpu.iota {dimensions = array<i32: 1>} : vector<1x2x128xi32>
    %c0_i32 = arith.constant 0 : i32
    %15 = vector.broadcast %c0_i32 : i32 to vector<1x2x128xi32>
    %16 = arith.cmpi eq, %14, %15 : vector<1x2x128xi32>
    %17 = vector.broadcast %5 : f32 to vector<1x2x128xf32>
    %18 = vector.broadcast %13 : f32 to vector<1x2x128xf32>
    %19 = arith.select %16, %17, %18 : vector<1x2x128xi1>, vector<1x2x128xf32>
    %c0_2 = arith.constant 0 : index
    %c0_3 = arith.constant 0 : index
    %c0_4 = arith.constant 0 : index
    %20 = vector.load %arg2[%c0_2, %c0_3, %c0_4] : memref<1x2x128xf32, #tpu.memory_space<vmem>>, vector<1x2x128xf32>
    tpu.vector_store %arg2[%c0_2, %c0_3, %c0_4], %19 {strides = array<i32>} : memref<1x2x128xf32, #tpu.memory_space<vmem>>, vector<1x2x128xf32>,
    return
  }
  func.func @transform_0(%arg0: i32) -> (i32, i32) {
    %c0_i32 = arith.constant 0 : i32
    %c0_i32_0 = arith.constant 0 : i32
    return %arg0, %c0_i32 : i32, i32
  }
  func.func @transform_1(%arg0: i32) -> (i32, i32, i32) {
    %c0_i32 = arith.constant 0 : i32
    %c0_i32_0 = arith.constant 0 : i32
    %c0_i32_1 = arith.constant 0 : i32
    return %arg0, %c0_i32, %c0_i32_0 : i32, i32, i32
  }
}

</mosaic_0001>

<bundles_post_ra>
// kernel: _reg_pallas.1
= control target key start
LH: loop header
LB: loop body
LE: loop exit
PB: predicated region body
PF: predicated region fallthrough
CT: control target
= control target key end

     0   :  { %s285_s6 = smov 0   ;;  %s311_s0 = inlined_call_operand.vmem [shape: f32[32,256], index: 0, kind: input, shape index: {}]   ;;  %s312_s1 = inlined_call_operand.vmem [shape: f32[2,2,128], index: 1, kind: output, shape index: {}]  }
   0x1 LB: > { %s291_s7 = sadd.s32 4294967295, %s272_s6   ;;  %p245_p0 = scmp.ge.s32.totalorder %s272_s6, 1  ;;  %s272_s6 = sphi %s285_s6, %s11_s6  }
   0x2   : > { %p89_p1 = scmp.lt.s32.totalorder %s272_s6, 3 }
   0x4   : > { %p90_p2 = pnand %p245_p0, %p89_p1 }
   0x5   : > { %s246_s8 = sshll.u32 (!%p90_p2), %s291_s7, 1  ;;  %s274_s13 = smov (!%p90_p2), 96   ;;  %vm152_vm0 = vcmask (!%p90_p2), 785408   ;;  %v181_v44 = vlaneseq (!%p90_p2) }
   0x6   : > { %93 = sbr.rel (%p90_p2) target bundleno = 354 (0x162), region = 24  ;;  %p110_p3 = scmp.lt.s32.totalorder (!%p90_p2), %s246_s8, 3 }
   0x7   : > { %p116_p4 = scmp.lt.s32.totalorder (!%p90_p2), %s291_s7, 1  ;;  %v182_v45 = vshrl.u32 (!%p90_p2), %v181_v44, 7 }
   0x9   : > { %vm183_vm1 = vcmp.eq.s32.totalorder (!%p90_p2), %v182_v45, 0 }
   0xd   : > { %s314_s8 = smov (!%p110_p3, %s246_s8), 3  ;;  %s316_s7 = smov (!%p116_p4, %s291_s7), 1 }
   0xe   : > { %s252_s9 = sshll.u32 %s314_s8, 4  ;;  %s249_s14 = sshll.u32 %s316_s7, 1 }
   0xf   : > { %s114_s12 = scalar_lea.vmem %s311_s0, %s252_s9  ;;  %s119_s18 = scalar_lea.vmem %s312_s1, %s249_s14 }
  0x10   : > { %v122_v0 = vld [vmem:[%s114_s12 + $0x10] sm:$0xff]  ;;  %v120_v1 = vld [vmem:[%s114_s12] sm:$0xff]  ;;  %v123_v2 = vld [vmem:[%s114_s12 + $0x18] sm:$0xff] }
  0x11   : > { %148 = vrot.lane.b32.xlu1 %v122_v0, %s274_s13  ;;  %144 = vrot.lane.b32.xlu0 %v120_v1, %s274_s13  ;;  %v121_v3 = vld [vmem:[%s114_s12 + $0x8] sm:$0xff]  ;;  %v124_v4 = vmul.f32 %v120_v1, %v120_v1  ;;  %v126_v6 = vmul.f32 %v122_v0, %v122_v0  ;;  %v127_v8 = vmul.f32 %v123_v2, %v123_v2 }
  0x12   : > { %v125_v5 = vmul.f32 %v121_v3, %v121_v3 }
  0x14   : > { %v128_v7 = vadd.f32 %v125_v5, %v124_v4 }
  0x15   : > { %150 = vrot.lane.b32.xlu1 %v123_v2, %s274_s13  ;;  %146 = vrot.lane.b32.xlu0 %v121_v3, %s274_s13 }
  0x16   : > { %v129_v9 = vadd.f32 %v128_v7, %v126_v6 }
  0x18   : > { %v130_v10 = vadd.f32 %v129_v9, %v127_v8 }
  0x34   : > { %131 = vadd.xlane.f32.xlu0 %v130_v10 }
  0x83   : > { %v149_v11 = vpop.permute.xlu1 %148  ;;  %v145_v12 = vpop.permute.xlu0 %144 }
  0x87   : > { %v151_v13 = vpop.permute.xlu1 %150  ;;  %v147_v14 = vpop.permute.xlu0 %146 }
  0x88   : > { %v154_v15 = vsel %vm152_vm0, %v149_v11, %v151_v13  ;;  %v162_v16 = vsub.f32 %v123_v2, %v151_v13  ;;  %v153_v17 = vsel %vm152_vm0, %v145_v12, %v147_v14  ;;  %v160_v18 = vsub.f32 %v121_v3, %v147_v14 }
  0x89   : > { %v161_v19 = vsub.f32 %v122_v0, %v154_v15  ;;  %v159_v20 = vsub.f32 %v120_v1, %v153_v17 }
  0x8a   : > { %v164_v21 = vmul.f32 %v160_v18, %v160_v18  ;;  %v166_v23 = vmul.f32 %v162_v16, %v162_v16 }
  0x8b   : > { %v163_v22 = vmul.f32 %v159_v20, %v159_v20  ;;  %v165_v25 = vmul.f32 %v161_v19, %v161_v19 }
  0x8c   : > { %v167_v24 = vsel %vm152_vm0, %v164_v21, 0.0  ;;  %v170_v28 = vsel %vm152_vm0, %v166_v23, 0.0 }
  0x8d   : > { %v168_v26 = vadd.f32 %v167_v24, %v163_v22 }
  0x8f   : > { %v169_v27 = vadd.f32 %v168_v26, %v165_v25 }
  0x91   : > { %v171_v29 = vadd.f32 %v170_v28, %v169_v27 }
  0x93   : > { %172 = vadd.xlane.f32.xlu1 %v171_v29 }
  0xc1   : > { %v132_v30 = vpop.xlane.xlu0 %131 }
  0xc2   : > { %v133_v31 = vrot.slane %v132_v30, 4 }
  0xc4   : > { %v134_v32 = vadd.f32 %v133_v31, %v132_v30 }
  0xc6   : > { %v135_v33 = vrot.slane %v134_v32, 2 }
  0xc8   : > { %v136_v34 = vadd.f32 %v135_v33, %v134_v32 }
  0xca   : > { %v137_v35 = vrot.slane %v136_v34, 1 }
  0xcc   : > { %v138_v36 = vadd.f32 %v137_v35, %v136_v34 }
  0xce   : > { %253 = vpush %v138_v36 }
  0xff   : > { %s254_s15 = spop %253 }
 0x100   : > { %v184_v46 = vstv %s254_s15 }
 0x120   : > { %v173_v37 = vpop.xlane.xlu1 %172 }
 0x121   : > { %v174_v38 = vrot.slane %v173_v37, 4 }
 0x123   : > { %v175_v39 = vadd.f32 %v174_v38, %v173_v37 }
 0x125   : > { %v176_v40 = vrot.slane %v175_v39, 2 }
 0x127   : > { %v177_v41 = vadd.f32 %v176_v40, %v175_v39 }
 0x129   : > { %v178_v42 = vrot.slane %v177_v41, 1 }
 0x12b   : > { %v179_v43 = vadd.f32 %v178_v42, %v177_v41 }
 0x12d   : > { %255 = vpush %v179_v43 }
 0x15e   : > { %s256_s19 = spop %255 }
 0x15f   : > { %v185_v47 = vstv %s256_s19 }
 0x160   : > { %v186_v48 = vsel %vm183_vm1, %v184_v46, %v185_v47 }
 0x161   : > { %187 = vst [vmem:[%s119_s18] sm:$0x3] %v186_v48 }
 0x162 PF: > { %s11_s6 = sadd.s32 1, %s272_s6  }
 0x163   : > { %p8_p5 = scmp.ge.s32.totalorder %s11_s6, 4  }
 0x165   :  { %10 = sbr.rel (!%p8_p5) target bundleno = 1 (0x1), region = 54 }

</bundles_post_ra>
